<compile_context>
chip_gen: v6e
topology: v6e:2x2x1
jax: 0.10.0
libtpu: 0.0.40
codegen_flags: <defaults>
</compile_context>

<pallas_src>
import jax
import jax.numpy as jnp
from jax.experimental import pallas as pl
from jax.experimental.pallas import tpu as pltpu

# ~4 MiB blocks: already at the ~85% HBM-roofline plateau; 2 in + 2 out
# double-buffered blocks (~16 MiB) stay well under the 32 MiB scoped-VMEM
# budget, which is valid on v5e/v6e and on v7x's 64 MiB physical VMEM.
MAX_BLOCK_BYTES = 4 << 20
VMEM_LIMIT_BYTES = 32 * 1024 * 1024


def _copy_kernel(x_ref, o_ref):
    # Pure lane-dense copy; identical 2-D layouts in and out.
    o_ref[...] = x_ref[...]


def _sublane_granule(itemsize):
    # 8 sublanes per vreg at 32-bit; sub-32-bit dtypes pack along sublanes, so
    # the legal/unmasked row granule is 8 * 4 / itemsize (8 f32, 16 bf16, 32 i8).
    return max(8, (8 * 4) // itemsize)


def _choose_tiles(B, F, itemsize, max_block_bytes=MAX_BLOCK_BYTES):
    """Pick (tile_b, tile_f) obeying the (8,128) rule with block bytes capped."""
    g = _sublane_granule(itemsize)
    total = B * F * itemsize

    if total <= max_block_bytes:
        # Whole array fits in one block.  If the copy is big enough to matter
        # and B allows a granule-aligned split, use 2 row blocks so both of
        # v7x's TensorCores issue DMAs (axis is "parallel"); zero cost on
        # single-TC parts.
        if total >= (2 << 20) and B >= 2 * g:
            half = ((B // 2 + g - 1) // g) * g
            return min(half, B), F
        return B, F

    # Prefer splitting rows while keeping the full lane dim F (always
    # lane-dense, always (8,128)-legal since tile_b is a multiple of g).
    rows = max_block_bytes // (F * itemsize)
    if rows >= g:
        return min(B, (rows // g) * g), F

    # Both dims large: tile BOTH dims so one block never exceeds the cap.
    # Smallest legal sublane block; lane dim a multiple of 128 sized to fit.
    tile_b = min(B, g)
    cols = (max_block_bytes // (tile_b * itemsize)) // 128 * 128
    cols = max(128, min(cols, F))
    return tile_b, cols


def unflatten(x, channel, height, width):
    """Pallas equivalent of Unflatten(channel, height, width)(x).

    x: (B, channel*height*width)  ->  (B, channel, height, width)
    """
    B, F = x.shape
    assert F == channel * height * width, "flat dim must equal C*H*W"

    itemsize = jnp.dtype(x.dtype).itemsize
    tile_b, tile_f = _choose_tiles(B, F, itemsize)
    grid = (pl.cdiv(B, tile_b), pl.cdiv(F, tile_f))

    out2d = pl.pallas_call(
        _copy_kernel,
        out_shape=jax.ShapeDtypeStruct((B, F), x.dtype),
        grid_spec=pltpu.PrefetchScalarGridSpec(
            num_scalar_prefetch=0,
            grid=grid,
            in_specs=[pl.BlockSpec((tile_b, tile_f), lambda i, j: (i, j))],
            out_specs=pl.BlockSpec((tile_b, tile_f), lambda i, j: (i, j)),
        ),
        # Identity copy with identical in/out BlockSpecs -> in-place aliasing is
        # safe; avoids allocating a second (B, F) HBM buffer when x is donated.
        input_output_aliases={0: 0},
        compiler_params=pltpu.CompilerParams(
            dimension_semantics=("parallel", "parallel"),
            vmem_limit_bytes=VMEM_LIMIT_BYTES,
        ),
        cost_estimate=pl.CostEstimate(
            flops=0,
            transcendentals=0,
            bytes_accessed=2 * B * F * itemsize,
        ),
    )(x)

    # Free metadata-only reshape on a contiguous (B, F) array.
    return jnp.reshape(out2d, (B, channel, height, width))


def unflatten_view(x, channel, height, width):
    """Production path (perf review #1): the op is a pure row-major view, so it
    is a free, metadata-only reshape with zero HBM traffic."""
    return jnp.reshape(x, (x.shape[0], channel, height, width))


if __name__ == "__main__":
    key = jax.random.PRNGKey(0)
    B, C, H, W = 2, 4, 16, 16

    # Input as produced by the upstream fc layer in expVAE: (B, C*H*W)
    x = jax.random.normal(key, (B, C * H * W), dtype=jnp.float32)

    out = jax.block_until_ready(unflatten(x, C, H, W))

    # Reference: PyTorch's input.view(B, C, H, W) == row-major reshape
    ref = x.reshape(B, C, H, W)
    assert out.shape == (B, C, H, W), out.shape
    assert out.dtype == x.dtype
    assert bool(jnp.array_equal(out, ref))
    assert bool(jnp.array_equal(unflatten_view(x, C, H, W), ref))

    print("KERNEL_OK")
</pallas_src>

<mosaic_0001>
module attributes {stable_mosaic.version = 11 : i64} {
  func.func @_copy_kernel(%arg0: i32, %arg1: i32, %arg2: memref<2x1024xf32, #tpu.memory_space<vmem>>, %arg3: memref<2x1024xf32, #tpu.memory_space<vmem>>) attributes {dimension_semantics = [#tpu.dimension_semantics<parallel>, #tpu.dimension_semantics<parallel>], iteration_bounds = array<i64: 1, 1>, scalar_prefetch = 0 : i64, scratch_operands = 0 : i64, tpu.core_type = #tpu.core_type<tc>, window_params = [{transform_indices = @transform_0, window_bounds = array<i64: 2, 1024>}, {transform_indices = @transform_1, window_bounds = array<i64: 2, 1024>}]} {
    %c0 = arith.constant 0 : index
    %c0_0 = arith.constant 0 : index
    %0 = vector.load %arg2[%c0, %c0_0] : memref<2x1024xf32, #tpu.memory_space<vmem>>, vector<2x1024xf32>
    %c0_1 = arith.constant 0 : index
    %c0_2 = arith.constant 0 : index
    %1 = vector.load %arg3[%c0_1, %c0_2] : memref<2x1024xf32, #tpu.memory_space<vmem>>, vector<2x1024xf32>
    tpu.vector_store %arg3[%c0_1, %c0_2], %0 {strides = array<i32>} : memref<2x1024xf32, #tpu.memory_space<vmem>>, vector<2x1024xf32>,
    return
  }
  func.func @transform_0(%arg0: i32, %arg1: i32) -> (i32, i32) {
    %c0_i32 = arith.constant 0 : i32
    return %arg0, %arg1 : i32, i32
  }
  func.func @transform_1(%arg0: i32, %arg1: i32) -> (i32, i32) {
    %c0_i32 = arith.constant 0 : i32
    return %arg0, %arg1 : i32, i32
  }
}

</mosaic_0001>

<bundles_post_ra>
// kernel: tpu_custom_call.1
= control target key start
LH: loop header
LB: loop body
LE: loop exit
PB: predicated region body
PF: predicated region fallthrough
CT: control target
= control target key end

     0   :  { %6 = vsyncpa [#allocation3], 0  ;;  %s104_s0 = inlined_call_operand.hbm [shape: f32[2,1024], index: 0, kind: input, shape index: {}, may-alias: {0,1}]   ;;  %s105_s1 = inlined_call_operand.hbm [shape: f32[2,1024], index: 1, kind: output, shape index: {}, may-alias: {0,1}]  }
   0x1   :  { %7 = vsyncpa [#allocation4], 0  ;;  %s86_s6 = smov [#allocation2]  }
   0x2   :  { %s14_s7 = sshll.u32 %s86_s6, 4  ;;  %s15_s7 = int_to_ptr.vmem [resolvable:$true] %s14_s7 }
   0x3   :  { %s50_s8 = scalar_lea.vmem %s15_s7, 256  ;;  %p55_p1 = scmp.lt.s32.totalorder %s15_s7, %s15_s7 }
   0x4   :  { %p51_p0 = scmp.ne.s32.totalorder %s15_s7, %s50_s8  ;;  %p56_p2 = scmp.lt.s32.totalorder %s50_s8, %s50_s8 }
   0x6   :  { %p57_p3 = por %p56_p2, %p55_p1 }
   0x8   :  { %p58_p4 = pnand %p57_p3, %p51_p0 }
   0xa   :  { %61 = shalt.err (!%p58_p4)
}
   0xb   :  { %17 = dma.hbm_to_vmem [thread:$0]  %s104_s0, 256, %s15_s7, [#allocation3]  }
   0xc   :  { %82 = dma.done.wait [#allocation3], 256  }
   0xd   :  { %83 = vsyncadd [#allocation3], 4294967040  ;;  %s87_s11 = smov [#allocation5]   ;;  %v21_v0 = vld [vmem:[#allocation2] sm:$0xff]  ;;  %v22_v1 = vld [vmem:[#allocation2 + $0x8] sm:$0xff] }
   0xe   :  { %s31_s12 = sshll.u32 %s87_s11, 4  ;;  %23 = vst [vmem:[#allocation5] sm:$0xff] %v21_v0  ;;  %24 = vst [vmem:[#allocation5 + $0x8] sm:$0xff] %v22_v1  ;;  %s32_s12 = int_to_ptr.vmem [resolvable:$true] %s31_s12 }
   0xf   :  { %s62_s13 = scalar_lea.vmem %s32_s12, 256  ;;  %p67_p6 = scmp.lt.s32.totalorder %s32_s12, %s32_s12 }
  0x10   :  { %p63_p5 = scmp.ne.s32.totalorder %s32_s12, %s62_s13  ;;  %p68_p7 = scmp.lt.s32.totalorder %s62_s13, %s62_s13 }
  0x12   :  { %p69_p8 = por %p68_p7, %p67_p6 }
  0x14   :  { %p70_p9 = pnand %p69_p8, %p63_p5 }
  0x16   :  { %73 = shalt.err (!%p70_p9)
}
  0x17   :  { %34 = dma.vmem_to_hbm [thread:$0]  %s32_s12, 256, %s105_s1, [#allocation4]  }
  0x18   :  { %84 = dma.done.wait [#allocation4], 256  }
  0x19   :  { %85 = vsyncadd [#allocation4], 4294967040 }
  0x1a   :  { %38 = vsyncpa [#allocation3], 1 }
  0x1b   :  { %39 = vsyncpa [#allocation4], 1 }

</bundles_post_ra>
